<compile_context>
chip_gen: v7x
topology: tpu7x:2x2x1
jax: 0.10.0
libtpu: 0.0.40
codegen_flags: <defaults>
</compile_context>

<pallas_src>
import functools
import math

import jax
import jax.numpy as jnp
from jax.experimental import pallas as pl
from jax.experimental.pallas import tpu as pltpu

_LOG_2PI = math.log(2.0 * math.pi)       # MVN(0, I_2) normalizer (D/2 * log 2pi, D=2)
_INV_04 = 2.5                            # 1 / 0.4
_K = 1.0 / (2.0 * 0.6 * 0.6)             # 1 / (2 * 0.6**2)
_LANES = 128


def _round_up(x: int, m: int) -> int:
    return ((x + m - 1) // m) * m


def _variational_loss_kernel(z0_ref, z_ref, out_ref, *, tile_rows: int, n_valid: int):
    """One batch tile: refs are (2, tile_rows, 128) slabs; out is (1, 128) partial sums."""
    i = pl.program_id(0)

    z0x = z0_ref[0].astype(jnp.float32)          # (tile_rows, 128)
    z0y = z0_ref[1].astype(jnp.float32)
    zx = z_ref[0].astype(jnp.float32)
    zy = z_ref[1].astype(jnp.float32)

    # log N(z0 | 0, I_2) without its constant (-log(2*pi) is added in the wrapper).
    base_lp = -0.5 * (z0x * z0x + z0y * z0y)

    # TODO(synk): TargetDistribution is not defined in the source snippet; the
    # Rezende & Mohamed (2015) "U1" potential is used as the stand-in energy U(z).
    r = jnp.sqrt(zx * zx + zy * zy)
    t = (r - 2.0) * _INV_04
    term1 = 0.5 * (t * t)
    # logaddexp(-K*(zx-2)^2, -K*(zx+2)^2) == -K*(|zx|-2)^2 + log1p(exp(-8K*|zx|))
    absx = jnp.abs(zx)
    u = absx - 2.0
    term2 = -_K * (u * u) + jnp.log1p(jnp.exp(-(8.0 * _K) * absx))
    energy = term1 - term2

    per_sample = base_lp + energy                # (tile_rows, 128)

    # Mask out padded samples (sample s lives at row s // 128, lane s % 128).
    row = jax.lax.broadcasted_iota(jnp.int32, per_sample.shape, 0)
    lane = jax.lax.broadcasted_iota(jnp.int32, per_sample.shape, 1)
    idx = (i * tile_rows + row) * _LANES + lane
    per_sample = jnp.where(idx < n_valid, per_sample, 0.0)

    # Per-lane partial sums for this tile (cross-sublane reduce, XLU slot).
    out_ref[...] = jnp.sum(per_sample, axis=0, keepdims=True)


def variational_loss(z0, z, sum_log_det_J, *, block_rows: int = 1024):
    """z0: (N, 2), z: (N, 2), sum_log_det_J: scalar -> scalar loss (float32)."""
    n = z0.shape[0]
    sldj = jnp.asarray(sum_log_det_J, jnp.float32)

    # Tiny batches: pallas_call dispatch overhead dwarfs the work -> plain JAX.
    if n < _LANES:
        return _variational_loss_ref(z0, z, sldj)

    block_rows = _round_up(max(block_rows, 8), 8)       # sublane-aligned tile
    rows = pl.cdiv(n, _LANES)
    tile_rows = min(block_rows, _round_up(rows, 8))
    num_tiles = pl.cdiv(rows, tile_rows)
    total_rows = num_tiles * tile_rows
    n_pad = total_rows * _LANES

    # Lane-dense coordinate-major slabs (2, total_rows, 128); the pad /
    # transpose / reshape is cheap layout plumbing done once in XLA.
    def to_slab(a):
        a = jnp.pad(a.astype(jnp.float32), ((0, n_pad - n), (0, 0)))
        return a.T.reshape(2, total_rows, _LANES)

    z0s = to_slab(z0)
    zs = to_slab(z)

    slab_spec = pl.BlockSpec((2, tile_rows, _LANES), lambda i: (0, i, 0))

    # Per-tile per-lane partial sums; last two dims of the block equal the
    # full array dims (1, 128) so the store is lane-dense and tile-aligned.
    partials = pl.pallas_call(
        functools.partial(_variational_loss_kernel,
                          tile_rows=tile_rows, n_valid=n),
        out_shape=jax.ShapeDtypeStruct((num_tiles, 1, _LANES), jnp.float32),
        grid=(num_tiles,),
        in_specs=[slab_spec, slab_spec],
        out_specs=pl.BlockSpec((None, 1, _LANES), lambda i: (i, 0, 0)),
        compiler_params=pltpu.CompilerParams(
            dimension_semantics=("parallel",)),
    )(z0s, zs)

    # Finish the mean over the true batch size; apply the Gaussian constant
    # and sum_log_det_J exactly once here.
    return jnp.sum(partials) / n - _LOG_2PI - sldj


def _variational_loss_ref(z0, z, sum_log_det_J):
    """Plain-JAX reference (same math) for correctness checking / tiny batches."""
    z0 = z0.astype(jnp.float32)
    z = z.astype(jnp.float32)
    base_lp = -0.5 * jnp.sum(z0 * z0, axis=-1) - _LOG_2PI
    z1, z2 = z[:, 0], z[:, 1]
    r = jnp.sqrt(z1 * z1 + z2 * z2)
    term1 = 0.5 * ((r - 2.0) / 0.4) ** 2
    term2 = jnp.logaddexp(-0.5 * ((z1 - 2.0) / 0.6) ** 2,
                          -0.5 * ((z1 + 2.0) / 0.6) ** 2)
    energy = term1 - term2
    return jnp.mean(base_lp + energy) - jnp.asarray(sum_log_det_J, jnp.float32)


if __name__ == "__main__":
    key = jax.random.PRNGKey(0)
    k0, k1 = jax.random.split(key)

    # Small batch of 2-D latent samples; N not a multiple of 128 so the
    # padding/masking path is exercised, block_rows=8 -> 2 grid tiles.
    N = 2000
    z0 = jax.random.normal(k0, (N, 2), dtype=jnp.float32)            # base samples
    z = z0 + 0.1 * jax.random.normal(k1, (N, 2), dtype=jnp.float32)  # flowed samples
    sum_log_det_J = 0.37

    loss = variational_loss(z0, z, sum_log_det_J, block_rows=8)
    jax.block_until_ready(loss)

    ref = _variational_loss_ref(z0, z, sum_log_det_J)
    assert jnp.allclose(loss, ref, rtol=1e-5, atol=1e-5), (loss, ref)

    print("KERNEL_OK")
</pallas_src>

<mosaic_0001>
module attributes {stable_mosaic.version = 11 : i64} {
  func.func @_variational_loss_kernel(%arg0: i32, %arg1: memref<2x8x128xf32, #tpu.memory_space<vmem>>, %arg2: memref<2x8x128xf32, #tpu.memory_space<vmem>>, %arg3: memref<1x1x128xf32, #tpu.memory_space<vmem>>) attributes {dimension_semantics = [#tpu.dimension_semantics<parallel>], iteration_bounds = array<i64: 2>, scalar_prefetch = 0 : i64, scratch_operands = 0 : i64, tpu.core_type = #tpu.core_type<tc>, window_params = [{transform_indices = @transform_0, window_bounds = array<i64: 2, 8, 128>}, {transform_indices = @transform_1, window_bounds = array<i64: 2, 8, 128>}, {transform_indices = @transform_2, window_bounds = array<i64: 1, 1, 128>}]} {
    %c0 = arith.constant 0 : index
    %c0_0 = arith.constant 0 : index
    %c0_1 = arith.constant 0 : index
    %0 = vector.load %arg1[%c0, %c0_0, %c0_1] : memref<2x8x128xf32, #tpu.memory_space<vmem>>, vector<1x8x128xf32>
    %1 = vector.shape_cast %0 : vector<1x8x128xf32> to vector<8x128xf32>
    %c1 = arith.constant 1 : index
    %c0_2 = arith.constant 0 : index
    %c0_3 = arith.constant 0 : index
    %2 = vector.load %arg1[%c1, %c0_2, %c0_3] : memref<2x8x128xf32, #tpu.memory_space<vmem>>, vector<1x8x128xf32>
    %3 = vector.shape_cast %2 : vector<1x8x128xf32> to vector<8x128xf32>
    %c0_4 = arith.constant 0 : index
    %c0_5 = arith.constant 0 : index
    %c0_6 = arith.constant 0 : index
    %4 = vector.load %arg2[%c0_4, %c0_5, %c0_6] : memref<2x8x128xf32, #tpu.memory_space<vmem>>, vector<1x8x128xf32>
    %5 = vector.shape_cast %4 : vector<1x8x128xf32> to vector<8x128xf32>
    %c1_7 = arith.constant 1 : index
    %c0_8 = arith.constant 0 : index
    %c0_9 = arith.constant 0 : index
    %6 = vector.load %arg2[%c1_7, %c0_8, %c0_9] : memref<2x8x128xf32, #tpu.memory_space<vmem>>, vector<1x8x128xf32>
    %7 = vector.shape_cast %6 : vector<1x8x128xf32> to vector<8x128xf32>
    %8 = arith.mulf %1, %1 : vector<8x128xf32>
    %9 = arith.mulf %3, %3 : vector<8x128xf32>
    %10 = arith.addf %8, %9 : vector<8x128xf32>
    %cst = arith.constant -5.000000e-01 : f32
    %11 = vector.broadcast %cst : f32 to vector<8x128xf32>
    %12 = arith.mulf %11, %10 : vector<8x128xf32>
    %13 = arith.mulf %5, %5 : vector<8x128xf32>
    %14 = arith.mulf %7, %7 : vector<8x128xf32>
    %15 = arith.addf %13, %14 : vector<8x128xf32>
    %16 = math.sqrt %15 : vector<8x128xf32>
    %cst_10 = arith.constant 2.000000e+00 : f32
    %17 = vector.broadcast %cst_10 : f32 to vector<8x128xf32>
    %18 = arith.subf %16, %17 : vector<8x128xf32>
    %cst_11 = arith.constant 2.500000e+00 : f32
    %19 = vector.broadcast %cst_11 : f32 to vector<8x128xf32>
    %20 = arith.mulf %18, %19 : vector<8x128xf32>
    %21 = arith.mulf %20, %20 : vector<8x128xf32>
    %cst_12 = arith.constant 5.000000e-01 : f32
    %22 = vector.broadcast %cst_12 : f32 to vector<8x128xf32>
    %23 = arith.mulf %22, %21 : vector<8x128xf32>
    %24 = math.absf %5 : vector<8x128xf32>
    %cst_13 = arith.constant 2.000000e+00 : f32
    %25 = vector.broadcast %cst_13 : f32 to vector<8x128xf32>
    %26 = arith.subf %24, %25 : vector<8x128xf32>
    %27 = arith.mulf %26, %26 : vector<8x128xf32>
    %cst_14 = arith.constant -1.38888884 : f32
    %28 = vector.broadcast %cst_14 : f32 to vector<8x128xf32>
    %29 = arith.mulf %28, %27 : vector<8x128xf32>
    %cst_15 = arith.constant -11.1111107 : f32
    %30 = vector.broadcast %cst_15 : f32 to vector<8x128xf32>
    %31 = arith.mulf %30, %24 : vector<8x128xf32>
    %32 = math.exp %31 : vector<8x128xf32>
    %33 = math.log1p %32 : vector<8x128xf32>
    %34 = arith.addf %29, %33 : vector<8x128xf32>
    %35 = arith.subf %23, %34 : vector<8x128xf32>
    %36 = arith.addf %12, %35 : vector<8x128xf32>
    %37 = tpu.iota {dimensions = array<i32: 0>} : vector<8x128xi32>
    %38 = tpu.iota {dimensions = array<i32: 1>} : vector<8x128xi32>
    %c8_i32 = arith.constant 8 : i32
    %39 = arith.muli %arg0, %c8_i32 : i32
    %40 = vector.broadcast %39 : i32 to vector<8x128xi32>
    %41 = arith.addi %40, %37 : vector<8x128xi32>
    %c128_i32 = arith.constant 128 : i32
    %42 = vector.broadcast %c128_i32 : i32 to vector<8x128xi32>
    %43 = arith.muli %41, %42 : vector<8x128xi32>
    %44 = arith.addi %43, %38 : vector<8x128xi32>
    %c2000_i32 = arith.constant 2000 : i32
    %45 = vector.broadcast %c2000_i32 : i32 to vector<8x128xi32>
    %46 = arith.cmpi slt, %44, %45 : vector<8x128xi32>
    %cst_16 = arith.constant 0.000000e+00 : f32
    %47 = vector.broadcast %cst_16 : f32 to vector<8x128xf32>
    %48 = arith.select %46, %36, %47 : vector<8x128xi1>, vector<8x128xf32>
    %cst_17 = arith.constant dense<0.000000e+00> : vector<128xf32>
    %49 = vector.multi_reduction <add>, %48, %cst_17 [0] : vector<8x128xf32> to vector<128xf32>
    %50 = vector.shape_cast %49 : vector<128xf32> to vector<1x128xf32>
    %c0_18 = arith.constant 0 : index
    %c0_19 = arith.constant 0 : index
    %c0_20 = arith.constant 0 : index
    %51 = vector.load %arg3[%c0_18, %c0_19, %c0_20] : memref<1x1x128xf32, #tpu.memory_space<vmem>>, vector<1x1x128xf32>
    %52 = vector.shape_cast %51 : vector<1x1x128xf32> to vector<1x128xf32>
    %53 = vector.shape_cast %50 : vector<1x128xf32> to vector<1x1x128xf32>
    tpu.vector_store %arg3[%c0_18, %c0_19, %c0_20], %53 {strides = array<i32>} : memref<1x1x128xf32, #tpu.memory_space<vmem>>, vector<1x1x128xf32>,
    return
  }
  func.func @transform_0(%arg0: i32) -> (i32, i32, i32) {
    %c0_i32 = arith.constant 0 : i32
    %c0_i32_0 = arith.constant 0 : i32
    %c0_i32_1 = arith.constant 0 : i32
    return %c0_i32, %arg0, %c0_i32_0 : i32, i32, i32
  }
  func.func @transform_1(%arg0: i32) -> (i32, i32, i32) {
    %c0_i32 = arith.constant 0 : i32
    %c0_i32_0 = arith.constant 0 : i32
    %c0_i32_1 = arith.constant 0 : i32
    return %c0_i32, %arg0, %c0_i32_0 : i32, i32, i32
  }
  func.func @transform_2(%arg0: i32) -> (i32, i32, i32) {
    %c0_i32 = arith.constant 0 : i32
    %c0_i32_0 = arith.constant 0 : i32
    %c0_i32_1 = arith.constant 0 : i32
    return %arg0, %c0_i32, %c0_i32_0 : i32, i32, i32
  }
}

</mosaic_0001>

<bundles_post_ra>
// kernel: tpu_custom_call.1
= control target key start
LH: loop header
LB: loop body
LE: loop exit
PB: predicated region body
PF: predicated region fallthrough
CT: control target
= control target key end

     0   :  { %7 = vsyncpa [#allocation3], 0  ;;  %s822_s0 = inlined_call_operand.hbm [shape: f32[2,16,128], index: 0, kind: input, shape index: {}]   ;;  %s823_s1 = inlined_call_operand.hbm [shape: f32[2,16,128], index: 1, kind: input, shape index: {}]   ;;  %s824_s2 = inlined_call_operand.hbm [shape: f32[2,1,128], index: 2, kind: output, shape index: {}]  }
   0x1   :  { %9 = vsyncpa [#allocation3 + $0x1], 0 }
   0x2   :  { %10 = vsyncpa [#allocation6], 0 }
   0x3   :  { %12 = vsyncpa [#allocation6 + $0x1], 0 }
   0x4   :  { %13 = vsyncpa [#allocation4], 0 }
   0x5   :  { %15 = vsyncpa [#allocation4 + $0x1], 0  ;;  %s593_s9 = smov 0   ;;  %s595_s10 = smov 0  }
   0x6   :  { %s597_s11 = smov 0   ;;  %s599_s12 = smov 0  }
   0x7 LB: > { %s614_s13 = sadd.s32 4294967295, %s570_s12   ;;  %s362_s14 = sadd.s32 4294967294, %s570_s12   ;;  %s570_s12 = sphi %s599_s12, %s841_s12   ;;  %s566_s11 = sphi %s597_s11, %s840_s11   ;;  %s562_s10 = sphi %s595_s10, %s839_s10   ;;  %s558_s9 = sphi %s593_s9, %s838_s9  }
   0x8   : > { %s618_s15 = sadd.s32 1, %s570_s12   ;;  %s28_s16 = sadd.s32 1, %s566_s11 }
   0x9   : > { %s25_s17 = ssub.s32 %s570_s12, %s618_s15  ;;  %p35_p0 = scmp.ne.s32.totalorder %s566_s11, %s562_s10 }
   0xa   : > { %p26_p1 = scmp.eq.s32.totalorder %s25_s17, 0  ;;  %p36_p2 = scmp.eq.s32.totalorder %s570_s12, 0 }
   0xb   : > { %p41_p3 = scmp.ne.s32.totalorder %s562_s10, %s558_s9  ;;  %p42_p4 = scmp.eq.s32.totalorder %s614_s13, 0 }
   0xc   : > { %s630_s18 = scalar_select %p26_p1, %s566_s11, %s28_s16  }
   0xd   : > { %p632_p5 = por %p36_p2, %p35_p0  ;;  %p636_p6 = por %p42_p4, %p41_p3 }
   0xe   : > { %p91_p7 = scmp.eq.s32.totalorder %s614_s13, 1  ;;  %p97_p8 = scmp.eq.s32.totalorder %s362_s14, 1 }
   0xf   : > { %s828_s20 = scalar_select %p636_p6, 1, 0 }
  0x10   : > { %p397_p10 = scmp.lt.s32.totalorder %s570_s12, 2  ;;  %p643_p11 = por %p91_p7, %p35_p0 }
  0x11   : > { %p647_p12 = por %p97_p8, %p41_p3  ;;  %s652_s23 = sand.u32 1, %s566_s11  }
  0x12   : > { %s829_s21 = scalar_select %p643_p11, 1, 0 }
  0x13   : > { %s830_s22 = scalar_select %p647_p12, 1, 0 }
  0x14   : > { %s366_s24 = sshll.u32 %s570_s12, 7  ;;  %s365_s25 = sshll.u32 %s652_s23, 4 }
  0x15   : > { %s661_s28 = scalar_lea.hbm %s822_s0, %s366_s24  ;;  %s121_s29 = scalar_lea.vmem [#allocation2], %s365_s25 }
  0x16   : > { %s127_s30 = sshll.u32 %s121_s29, 4  ;;  %p667_p13 = pnand %p397_p10, %p632_p5  ;;  %s671_s30 = int_to_ptr.vmem [resolvable:$true] %s127_s30 }
  0x17   : > { %s118_s4 = scalar_lea.sflag [#allocation3], %s652_s23  ;;  %s440_s5 = scalar_lea.hbm %s661_s28, 256 }
  0x18   : > { %p441_p1 = scmp.ne.s32.totalorder %s661_s28, %s440_s5  ;;  %p442_p2 = pneg %p667_p13 }
  0x19   : > { %s445_s8 = scalar_lea.hbm %s822_s0, 512  ;;  %p446_p5 = scmp.lt.u32.totalorder %s661_s28, %s822_s0 }
  0x1a   : > { %p443_p3 = pnand %p442_p2, %p441_p1  ;;  %p447_p7 = scmp.lt.u32.totalorder %s445_s8, %s440_s5 }
  0x1b   : > { %p449_p10 = scmp.lt.u32.totalorder %s440_s5, %s661_s28 }
  0x1c   : > { %p444_p4 = pneg %p443_p3  ;;  %p448_p8 = por %p447_p7, %p446_p5 }
  0x1e   : > { %p450_p9 = por %p449_p10, %p448_p8 }
  0x20   : > { %p451_p0 = pnand %p450_p9, %p444_p4 }
  0x22   : > { %454 = shalt.err (!%p451_p0)
}
  0x23   : > { %s455_s17 = scalar_lea.vmem %s671_s30, 256  ;;  %s572_s19 = smov [#allocation2]  }
  0x24   : > { %p456_p1 = scmp.ne.s32.totalorder %s671_s30, %s455_s17  ;;  %s460_s26 = sshll.u32 %s572_s19, 4  ;;  %s461_s26 = int_to_ptr.vmem [resolvable:$false] %s460_s26 }
  0x25   : > { %s462_s27 = scalar_lea.vmem %s461_s26, 512  ;;  %p463_p11 = scmp.lt.s32.totalorder %s671_s30, %s461_s26 }
  0x26   : > { %p458_p3 = pnand %p456_p1, %p442_p2  ;;  %p464_p5 = scmp.lt.s32.totalorder %s462_s27, %s455_s17 }
  0x28   : > { %p459_p12 = pneg %p458_p3  ;;  %p465_p7 = por %p464_p5, %p463_p11 }
  0x2a   : > { %p466_p8 = pnand %p465_p7, %p459_p12 }
  0x2c   : > { %469 = shalt.err (!%p466_p8)
}
  0x2d   : > { %s573_s29 = smov 256   ;;  %s574_s5 = smov 128  }
  0x2e   : > { %s575_s6 = smov 8   ;;  %p155_p9 = scmp.lt.s32.totalorder %s570_s12, 3 }
  0x2f   : > { %389 = dma.hbm_to_vmem [thread:$0]  (!%p667_p13), %s661_s28, 256, %s671_s30, %s118_s4, %s573_s29, %s574_s5, %s575_s6  }
  0x30   : > { %s711_s14 = scalar_lea.hbm %s823_s1, %s366_s24  ;;  %p832_p11 = scmp.ge.s32.totalorder %s570_s12, 1 }
  0x31   : > { %s141_s17 = scalar_lea.vmem [#allocation5], %s365_s25  ;;  %s138_s28 = scalar_lea.sflag [#allocation6], %s652_s23 }
  0x32   : > { %p715_p12 = pnand %p832_p11, %p155_p9  ;;  %s147_s19 = sshll.u32 %s141_s17, 4  ;;  %s721_s19 = int_to_ptr.vmem [resolvable:$true] %s147_s19 }
  0x33   : > { %s470_s30 = scalar_lea.hbm %s711_s14, 256  ;;  %s475_s26 = scalar_lea.hbm %s823_s1, 512 }
  0x34   : > { %p471_p0 = scmp.ne.s32.totalorder %s711_s14, %s470_s30  ;;  %p476_p1 = scmp.lt.u32.totalorder %s711_s14, %s823_s1 }
  0x35   : > { %p477_p3 = scmp.lt.u32.totalorder %s475_s26, %s470_s30  ;;  %p479_p7 = scmp.lt.u32.totalorder %s470_s30, %s711_s14 }
  0x36   : > { %p473_p4 = pnand %p471_p0, %p442_p2 }
  0x37   : > { %p478_p5 = por %p477_p3, %p476_p1 }
  0x38   : > { %p474_p10 = pneg %p473_p4 }
  0x39   : > { %p480_p8 = por %p479_p7, %p478_p5 }
  0x3b   : > { %p481_p9 = pnand %p480_p8, %p474_p10 }
  0x3d   : > { %484 = shalt.err (!%p481_p9)
}
  0x3e   : > { %s485_s25 = scalar_lea.vmem %s721_s19, 256  ;;  %s576_s8 = smov [#allocation5]  }
  0x3f   : > { %p486_p11 = scmp.ne.s32.totalorder %s721_s19, %s485_s25  ;;  %s490_s17 = sshll.u32 %s576_s8, 4  ;;  %s491_s17 = int_to_ptr.vmem [resolvable:$false] %s490_s17 }
  0x40   : > { %s492_s24 = scalar_lea.vmem %s491_s17, 512  ;;  %p493_p6 = scmp.lt.s32.totalorder %s721_s19, %s491_s17 }
  0x41   : > { %p488_p0 = pnand %p486_p11, %p442_p2  ;;  %p494_p1 = scmp.lt.s32.totalorder %s492_s24, %s485_s25 }
  0x43   : > { %p489_p4 = pneg %p488_p0  ;;  %p495_p3 = por %p494_p1, %p493_p6 }
  0x45   : > { %p496_p5 = pnand %p495_p3, %p489_p4 }
  0x47   : > { %499 = shalt.err (!%p496_p5)
}
  0x48   : > { %392 = dma.hbm_to_vmem [thread:$0]  (!%p667_p13), %s711_s14, 256, %s721_s19, %s138_s28, %s573_s29, %s574_s5, %s575_s6  }
  0x49   : > { %159 = sbr.rel (%p715_p12) target bundleno = 150 (0x96), region = 28  ;;  %s755_s30 = sand.u32 (!%p715_p12), 1, %s562_s10  }
  0x4a   : > { %s370_s4 = sshll.u32 (!%p715_p12), %s755_s30, 4  ;;  %s162_s26 = scalar_lea.sflag (!%p715_p12), [#allocation3], %s755_s30 }
  0x4b   : > { %s759_s3 = scalar_lea.vmem (!%p715_p12), [#allocation2], %s370_s4  ;;  %p834_p6 = scmp.ne.s32.totalorder (!%p715_p12), %s828_s20, 0 }
  0x50   : > { %545 = dma.done.wait (%p834_p6), %s162_s26, 256  }
  0x51   : > { %547 = vsyncadd (%p834_p6), %s162_s26, 4294967040  ;;  %s171_s23 = scalar_lea.sflag [#allocation6], %s755_s30  ;;  %s174_s29 = scalar_lea.vmem [#allocation5], %s370_s4 }
  0x52   : > { %549 = dma.done.wait (%p834_p6), %s171_s23, 256  }
  0x53   : > { %551 = vsyncadd (%p834_p6), %s171_s23, 4294967040  ;;  %v202_v0 = vld [vmem:[%s174_s29] sm:$0xff]  ;;  %v373_v1 = vld [vmem:[%s174_s29 + $0x8] sm:$0xff]  ;;  %v242_v12 = vlaneseq  ;;  %s376_s20 = sshll.u32 %s614_s13, 3  ;;  %s198_s5 = scalar_lea.vmem [#allocation7], %s755_s30 }
  0x54   : > { %v209_v2 = vmul.f32 %v202_v0, %v202_v0  ;;  %v223_v3 = vand.u32 2147483647, %v202_v0  ;;  %v210_v4 = vmul.f32 %v373_v1, %v373_v1  ;;  %v247_v20 = vstv %s376_s20  ;;  %v199_v21 = vld [vmem:[%s759_s3] sm:$0xff]  ;;  %v372_v22 = vld [vmem:[%s759_s3 + $0x8] sm:$0xff]  ;;  %s273_s6 = sshll.u32 %s198_s5, 4  ;;  %s377_s14 = sshll.u32 %s614_s13, 4  ;;  %s775_s6 = int_to_ptr.vmem [resolvable:$true] %s273_s6 }
  0x55   : > { %v243_v18 = vshrl.u32 %v242_v12, 7  ;;  %v205_v26 = vmul.f32 %v199_v21, %v199_v21  ;;  %v206_v27 = vmul.f32 %v372_v22, %v372_v22  ;;  %v245_v32 = vand.u32 127, %v242_v12  ;;  %s780_s28 = scalar_lea.hbm %s824_s2, %s377_s14  ;;  %s261_s27 = scalar_lea.sflag [#allocation4], %s755_s30 }
  0x56   : > { %v227_v5 = vmul.f32 -11.111111, %v223_v3  ;;  %v211_v6 = vadd.f32 %v210_v4, %v209_v2  ;;  %v375_v19 = vadd.f32 -2.0, %v223_v3  ;;  %s500_s7 = scalar_lea.vmem %s775_s6, 16  ;;  %p835_p2 = scmp.ne.s32.totalorder %s829_s21, 0 }
  0x57   : > { %v248_v25 = vadd.s32 %v247_v20, %v243_v18  ;;  %v207_v35 = vadd.f32 %v206_v27, %v205_v26  ;;  %p501_p13 = scmp.ne.s32.totalorder %s775_s6, %s500_s7  ;;  %s577_s13 = smov [#allocation7]  }
  0x58   : > { %v228_v7 = vmul.f32 1.442695, %v227_v5  ;;  %434 = vrsqrt.f32 %v211_v6  ;;  %vm214_vm0 = vcmp.eq.f32.partialorder %v211_v6, inf  ;;  %v217_v9 = vand.u32 2147483648, %v211_v6  ;;  %s504_s25 = sshll.u32 %s577_s13, 4  ;;  %s505_s25 = int_to_ptr.vmem [resolvable:$false] %s504_s25 }
  0x59   : > { %vm216_vm1 = vcmp.eq.f32.partialorder %v211_v6, 0.0  ;;  %v225_v28 = vmul.f32 %v375_v19, %v375_v19  ;;  %v249_v33 = vmul.u32 128, %v248_v25  ;;  %v208_v41 = vmul.f32 -0.5, %v207_v35  ;;  %p502_p12 = pnand %p501_p13, %p835_p2  ;;  %s506_s8 = scalar_lea.vmem %s505_s25, 32 }
  0x5a   : > { %436 = vpow2.f32 %v228_v7  ;;  %p507_p7 = scmp.lt.s32.totalorder %s775_s6, %s505_s25  ;;  %p508_p8 = scmp.lt.s32.totalorder %s506_s8, %s500_s7 }
  0x5b   : > { %v226_v36 = vmul.f32 -1.3888888, %v225_v28  ;;  %v250_v40 = vadd.s32 %v249_v33, %v245_v32  ;;  %p503_p10 = pneg %p502_p12 }
  0x5c   : > { %p509_p9 = por %p508_p8, %p507_p7 }
  0x5d   : > { %vm251_vm3 = vcmp.lt.s32.totalorder %v250_v40, 2000 }
  0x5e   : > { %p510_p11 = pnand %p509_p9, %p503_p10 }
  0x62   : > { %v435_v8 = vpop.eup %434 }
  0x63   : > { %v213_v11 = vmul.f32 %v435_v8, %v211_v6 }
  0x64   : > { %v437_v10 = vpop.eup %436 }
  0x65   : > { %v230_v13 = vadd.f32 1.0, %v437_v10  ;;  %v215_v14 = vsel %vm214_vm0, %v211_v6, %v213_v11  ;;  %v233_v17 = vmul.f32 -0.5, %v437_v10  ;;  %v236_v29 = vand.u32 2147483647, %v437_v10 }
  0x66   : > { %v218_v15 = vsel %vm216_vm1, %v217_v9, %v215_v14 }
  0x67   : > { %438 = vlog2.f32 %v230_v13  ;;  %v374_v16 = vadd.f32 -2.0, %v218_v15  ;;  %v234_v24 = vadd.f32 1.0, %v233_v17  ;;  %vm237_vm2 = vcmp.lt.f32.partialorder %v236_v29, 0.0004427343 }
  0x69   : > { %v220_v23 = vmul.f32 2.5, %v374_v16  ;;  %v235_v31 = vmul.f32 %v437_v10, %v234_v24 }
  0x6b   : > { %v221_v30 = vmul.f32 %v220_v23, %v220_v23 }
  0x6d   : > { %v222_v38 = vmul.f32 0.5, %v221_v30 }
  0x71   : > { %v439_v34 = vpop.eup %438 }
  0x72   : > { %v232_v37 = vmul.f32 0.6931472, %v439_v34 }
  0x74   : > { %v238_v39 = vsel %vm237_vm2, %v235_v31, %v232_v37 }
  0x75   : > { %v239_v42 = vadd.f32 %v238_v39, %v226_v36 }
  0x77   : > { %v240_v43 = vsub.f32 %v222_v38, %v239_v42 }
  0x79   : > { %v241_v44 = vadd.f32 %v240_v43, %v208_v41 }
  0x7b   : > { %v252_v45 = vsel %vm251_vm3, %v241_v44, 0.0 }
  0x7c   : > { %v253_v46 = vrot.slane %v252_v45, 4 }
  0x7e   : > { %v254_v47 = vadd.f32 %v253_v46, %v252_v45 }
  0x80   : > { %v255_v48 = vrot.slane %v254_v47, 2 }
  0x82   : > { %v256_v49 = vadd.f32 %v255_v48, %v254_v47 }
  0x84   : > { %v257_v50 = vrot.slane %v256_v49, 1 }
  0x86   : > { %v258_v51 = vadd.f32 %v257_v50, %v256_v49 }
  0x88   : > { %259 = vst [vmem:[%s198_s5] sm:$0x1] %v258_v51 }
  0x89   : > { %513 = shalt.err (!%p510_p11)
}
  0x8a   : > { %s514_s17 = scalar_lea.hbm %s780_s28, 16  ;;  %s518_s4 = scalar_lea.hbm %s824_s2, 32 }
  0x8b   : > { %p515_p0 = scmp.ne.s32.totalorder %s780_s28, %s514_s17  ;;  %p519_p3 = scmp.lt.u32.totalorder %s780_s28, %s824_s2 }
  0x8c   : > { %p520_p5 = scmp.lt.u32.totalorder %s518_s4, %s514_s17  ;;  %p522_p13 = scmp.lt.u32.totalorder %s514_s17, %s780_s28 }
  0x8d   : > { %p516_p4 = pnand %p515_p0, %p835_p2 }
  0x8e   : > { %p521_p6 = por %p520_p5, %p519_p3 }
  0x8f   : > { %p517_p1 = pneg %p516_p4 }
  0x90   : > { %p523_p12 = por %p522_p13, %p521_p6 }
  0x92   : > { %p524_p10 = pnand %p523_p12, %p517_p1 }
  0x94   : > { %527 = shalt.err (!%p524_p10)
}
  0x95   : > { %384 = dma.vmem_to_hbm [thread:$0]  (%p835_p2), %s775_s6, 16, %s780_s28, %s261_s27  }
  0x96 PF: > { %s285_s23 = sand.u32 1, %s558_s9   ;;  %p836_p7 = scmp.ne.s32.totalorder %s830_s22, 0 }
  0x97   : > { %p837_p8 = scmp.ge.s32.totalorder %s570_s12, 2  ;;  %s286_s29 = scalar_lea.sflag [#allocation4], %s285_s23 }
  0x99   : > { %p394_p9 = pnand %p837_p8, %p836_p7 }
  0x9b   : > { %553 = dma.done.wait (!%p394_p9), %s286_s29, 16  }
  0x9c   : > { %555 = vsyncadd (!%p394_p9), %s286_s29, 4294967280  ;;  %p18_p11 = scmp.ge.s32.totalorder %s618_s15, 4   ;;  %s838_s9 = smov %s562_s10 }
  0x9d   : > { %s839_s10 = smov %s566_s11  ;;  %s840_s11 = smov %s630_s18 }
  0x9e   : > { %s841_s12 = smov %s618_s15  ;;  %20 = sbr.rel (!%p18_p11) target bundleno = 7 (0x7), region = 88 }
  0xa5   :  { %290 = vsyncpa [#allocation3], 1 }
  0xa6   :  { %292 = vsyncpa [#allocation3 + $0x1], 1 }
  0xa7   :  { %293 = vsyncpa [#allocation6], 1 }
  0xa8   :  { %295 = vsyncpa [#allocation6 + $0x1], 1 }
  0xa9   :  { %296 = vsyncpa [#allocation4], 1 }
  0xaa   :  { %298 = vsyncpa [#allocation4 + $0x1], 1 }

</bundles_post_ra>
